<compile_context>
chip_gen: v6e
topology: v6e:2x2x1
jax: 0.10.0
libtpu: 0.0.40
codegen_flags: <defaults>
</compile_context>

<pallas_src>
import jax
import jax.numpy as jnp
from jax.experimental import pallas as pl
from jax.experimental.pallas import tpu as pltpu


def _avg_pool_kernel(h_ref, m_ref, o_ref):
    # h_ref: (TB, L, D) native dtype   m_ref: (TB, L) f32   o_ref: (TB, D) f32
    h = h_ref[...].astype(jnp.float32)
    m = m_ref[...]                                   # already f32

    masked = h * m[:, :, None]                       # broadcast mask over D
    summed = jnp.sum(masked, axis=1)                 # (TB, D), f32 accumulation
    lens = jnp.sum(m, axis=1, keepdims=True)         # (TB, 1)

    inv = pl.reciprocal(lens + 1e-8, approx=False)   # one recip per row, then a mul
    o_ref[...] = (summed * inv).astype(o_ref.dtype)


def _choose_tb(B, L, D, itemsize):
    """Rows per grid step: ~16 MiB histories tile, multiple of 8, >=2 steps if possible."""
    row_bytes = max(L * D * itemsize, 1)
    tb = (16 * 1024 * 1024) // row_bytes
    tb = max(8, min(tb, 1024))
    tb = (tb // 8) * 8
    bp_min = -(-B // 8) * 8                          # batch rounded up to sublane multiple
    tb = min(tb, bp_min)
    # Prefer >= 2 grid steps so v7x's two TensorCores both get work.
    if bp_min >= 16:
        while tb > 8 and -(-bp_min // tb) < 2:
            tb = max(8, ((tb // 2) // 8) * 8)
    return tb


def average_pooling(histories, mask, *, tb=None):
    """Masked average pooling over the L axis.

    histories: [B, L, D] (any float dtype; accumulated in f32 in-kernel)
    mask:      [B, L]    (any numeric / bool dtype; treated like .float())
    returns:   [B, D]    float32
    """
    B, L, D = histories.shape
    itemsize = jnp.dtype(histories.dtype).itemsize
    if tb is None:
        tb = _choose_tb(B, L, D, itemsize)

    # Pad the batch up to a multiple of tb (padded rows have mask == 0 and are sliced off).
    Bp = -(-B // tb) * tb
    mask_f = mask.astype(jnp.float32)
    if Bp != B:
        histories = jnp.pad(histories, ((0, Bp - B), (0, 0), (0, 0)))
        mask_f = jnp.pad(mask_f, ((0, Bp - B), (0, 0)))

    # Explicit VMEM budget: 2 double-buffered inputs + double-buffered output, +25% headroom.
    h_bytes = tb * L * D * itemsize
    m_bytes = tb * L * 4
    o_bytes = tb * D * 4
    needed = 2 * (h_bytes + m_bytes + o_bytes)
    vmem_limit = int(min(max(needed * 5 // 4 + (2 << 20), 32 << 20), 56 << 20))

    out = pl.pallas_call(
        _avg_pool_kernel,
        out_shape=jax.ShapeDtypeStruct((Bp, D), jnp.float32),
        grid=(Bp // tb,),
        in_specs=[
            pl.BlockSpec((tb, L, D), lambda b: (b, 0, 0)),   # native dtype, streamed
            pl.BlockSpec((tb, L), lambda b: (b, 0)),         # 2-D mask, L on lanes
        ],
        out_specs=pl.BlockSpec((tb, D), lambda b: (b, 0)),   # sublane/lane-dense slab
        compiler_params=pltpu.CompilerParams(
            dimension_semantics=("parallel",),
            vmem_limit_bytes=vmem_limit,
        ),
    )(histories, mask_f)

    return out[:B]
    # NOTE: for extremely large L*D per row one would add a second ("arbitrary") grid
    # axis over L with a VMEM scratch accumulator; not needed at these shapes.


def _reference(histories, mask):
    # Pure-JAX mirror of the PyTorch forward.
    fm = mask.astype(jnp.float32)[..., None]
    lens = jnp.sum(fm, axis=1)
    s = jnp.sum(histories.astype(jnp.float32) * fm, axis=1)
    return s / (lens + 1e-8)


if __name__ == "__main__":
    key = jax.random.PRNGKey(0)

    # Test 1: small f32 case matching the module's convention (D = nfields * E).
    k1, k2, k3, k4 = jax.random.split(key, 4)
    B, L, D = 2, 8, 32
    histories = jax.random.normal(k1, (B, L, D), dtype=jnp.float32)
    mask = (jax.random.uniform(k2, (B, L)) > 0.4).astype(jnp.float32)
    mask = mask.at[:, 0].set(1.0)  # at least one valid position per row

    out = average_pooling(histories, mask)
    jax.block_until_ready(out)
    ref = _reference(histories, mask)
    assert out.shape == (B, D)
    assert jnp.allclose(out, ref, atol=1e-5, rtol=1e-5), "mismatch vs reference (f32 case)"

    # Test 2: bf16 histories, batch not a multiple of the row-tile, non-128-multiple D.
    B2, L2, D2 = 20, 16, 96
    h2 = jax.random.normal(k3, (B2, L2, D2), dtype=jnp.bfloat16)
    m2 = (jax.random.uniform(k4, (B2, L2)) > 0.3).astype(jnp.float32)
    m2 = m2.at[:, 0].set(1.0)

    out2 = average_pooling(h2, m2)
    jax.block_until_ready(out2)
    ref2 = _reference(h2, m2)
    assert out2.shape == (B2, D2)
    assert jnp.allclose(out2, ref2, atol=1e-4, rtol=1e-4), "mismatch vs reference (bf16 case)"

    print("KERNEL_OK")
</pallas_src>

<mosaic_0001>
module attributes {stable_mosaic.version = 11 : i64} {
  func.func @_avg_pool_kernel(%arg0: i32, %arg1: memref<8x8x32xf32, #tpu.memory_space<vmem>>, %arg2: memref<8x8xf32, #tpu.memory_space<vmem>>, %arg3: memref<8x32xf32, #tpu.memory_space<vmem>>) attributes {dimension_semantics = [#tpu.dimension_semantics<parallel>], iteration_bounds = array<i64: 1>, scalar_prefetch = 0 : i64, scratch_operands = 0 : i64, tpu.core_type = #tpu.core_type<tc>, window_params = [{transform_indices = @transform_0, window_bounds = array<i64: 8, 8, 32>}, {transform_indices = @transform_1, window_bounds = array<i64: 8, 8>}, {transform_indices = @transform_2, window_bounds = array<i64: 8, 32>}]} {
    %c0 = arith.constant 0 : index
    %c0_0 = arith.constant 0 : index
    %c0_1 = arith.constant 0 : index
    %0 = vector.load %arg1[%c0, %c0_0, %c0_1] : memref<8x8x32xf32, #tpu.memory_space<vmem>>, vector<8x8x32xf32>
    %c0_2 = arith.constant 0 : index
    %c0_3 = arith.constant 0 : index
    %1 = vector.load %arg2[%c0_2, %c0_3] : memref<8x8xf32, #tpu.memory_space<vmem>>, vector<8x8xf32>
    %2 = vector.shape_cast %1 : vector<8x8xf32> to vector<8x8x1xf32>
    %3 = vector.broadcast %2 : vector<8x8x1xf32> to vector<8x8x32xf32>
    %4 = arith.mulf %0, %3 : vector<8x8x32xf32>
    %cst = arith.constant dense<0.000000e+00> : vector<8x32xf32>
    %5 = vector.multi_reduction <add>, %4, %cst [1] : vector<8x8x32xf32> to vector<8x32xf32>
    %cst_4 = arith.constant dense<0.000000e+00> : vector<8xf32>
    %6 = vector.multi_reduction <add>, %1, %cst_4 [1] : vector<8x8xf32> to vector<8xf32>
    %7 = vector.shape_cast %6 : vector<8xf32> to vector<8x1xf32>
    %cst_5 = arith.constant 9.99999993E-9 : f32
    %8 = vector.broadcast %cst_5 : f32 to vector<8x1xf32>
    %9 = arith.addf %7, %8 : vector<8x1xf32>
    %10 = tpu.reciprocal %9 : vector<8x1xf32> -> vector<8x1xf32>
    %11 = vector.broadcast %10 : vector<8x1xf32> to vector<8x32xf32>
    %12 = arith.mulf %5, %11 : vector<8x32xf32>
    %c0_6 = arith.constant 0 : index
    %c0_7 = arith.constant 0 : index
    %13 = vector.load %arg3[%c0_6, %c0_7] : memref<8x32xf32, #tpu.memory_space<vmem>>, vector<8x32xf32>
    tpu.vector_store %arg3[%c0_6, %c0_7], %12 {strides = array<i32>} : memref<8x32xf32, #tpu.memory_space<vmem>>, vector<8x32xf32>,
    return
  }
  func.func @transform_0(%arg0: i32) -> (i32, i32, i32) {
    %c0_i32 = arith.constant 0 : i32
    %c0_i32_0 = arith.constant 0 : i32
    %c0_i32_1 = arith.constant 0 : i32
    return %arg0, %c0_i32, %c0_i32_0 : i32, i32, i32
  }
  func.func @transform_1(%arg0: i32) -> (i32, i32) {
    %c0_i32 = arith.constant 0 : i32
    %c0_i32_0 = arith.constant 0 : i32
    return %arg0, %c0_i32 : i32, i32
  }
  func.func @transform_2(%arg0: i32) -> (i32, i32) {
    %c0_i32 = arith.constant 0 : i32
    %c0_i32_0 = arith.constant 0 : i32
    return %arg0, %c0_i32 : i32, i32
  }
}

</mosaic_0001>

<bundles_post_ra>
// kernel: tpu_custom_call.1
= control target key start
LH: loop header
LB: loop body
LE: loop exit
PB: predicated region body
PF: predicated region fallthrough
CT: control target
= control target key end

     0   :  { %7 = vsyncpa [#allocation3], 0  ;;  %s356_s0 = inlined_call_operand.hbm [shape: f32[8,8,32], index: 0, kind: input, shape index: {}]   ;;  %s357_s1 = inlined_call_operand.hbm [shape: f32[8,8], index: 1, kind: input, shape index: {}]   ;;  %s358_s2 = inlined_call_operand.hbm [shape: f32[8,32], index: 2, kind: output, shape index: {}]  }
   0x1   :  { %8 = vsyncpa [#allocation6], 0 }
   0x2   :  { %9 = vsyncpa [#allocation4], 0  ;;  %s318_s9 = smov [#allocation2]  }
   0x3   :  { %s15_s10 = sshll.u32 %s318_s9, 4  ;;  %s16_s10 = int_to_ptr.vmem [resolvable:$true] %s15_s10 }
   0x4   :  { %s260_s11 = scalar_lea.vmem %s16_s10, 1024  ;;  %p265_p1 = scmp.lt.s32.totalorder %s16_s10, %s16_s10 }
   0x5   :  { %p261_p0 = scmp.ne.s32.totalorder %s16_s10, %s260_s11  ;;  %p266_p2 = scmp.lt.s32.totalorder %s260_s11, %s260_s11 }
   0x7   :  { %p267_p3 = por %p266_p2, %p265_p1 }
   0x9   :  { %p268_p4 = pnand %p267_p3, %p261_p0 }
   0xb   :  { %271 = shalt.err (!%p268_p4)
}
   0xc   :  { %s319_s12 = smov 128   ;;  %s320_s13 = smov 8  }
   0xd   :  { %21 = dma.hbm_to_vmem [thread:$0]  %s356_s0, 1024, %s16_s10, [#allocation3], %s319_s12, %s319_s12, %s320_s13  }
   0xe   :  { %s321_s16 = smov [#allocation5]  }
   0xf   :  { %s28_s17 = sshll.u32 %s321_s16, 4  ;;  %s29_s17 = int_to_ptr.vmem [resolvable:$true] %s28_s17 }
  0x10   :  { %s280_s18 = scalar_lea.vmem %s29_s17, 128  ;;  %p285_p6 = scmp.lt.s32.totalorder %s29_s17, %s29_s17 }
  0x11   :  { %p281_p5 = scmp.ne.s32.totalorder %s29_s17, %s280_s18  ;;  %p286_p7 = scmp.lt.s32.totalorder %s280_s18, %s280_s18 }
  0x13   :  { %p287_p8 = por %p286_p7, %p285_p6 }
  0x15   :  { %p288_p9 = pnand %p287_p8, %p281_p5 }
  0x17   :  { %291 = shalt.err (!%p288_p9)
}
  0x18   :  { %31 = dma.hbm_to_vmem [thread:$0]  %s357_s1, 128, %s29_s17, [#allocation6]  }
  0x19   :  { %312 = dma.done.wait [#allocation3], 1024  }
  0x1a   :  { %313 = vsyncadd [#allocation3], 4294966272 }
  0x1b   :  { %314 = dma.done.wait [#allocation6], 128  }
  0x1c   :  { %315 = vsyncadd [#allocation6], 4294967168  ;;  %v47_v0 = vlaneseq  ;;  %vm168_vm0 = vcmask 64512   ;;  %v46_v4 = vld [vmem:[#allocation5] sm:$0xff]  ;;  %v40_v22 = vld [vmem:[#allocation2 + $0x10] sm:$0xff]  ;;  %vm111_vm1 = vcmask 261120  }
  0x1d   :  { %v169_v5 = vsel %vm168_vm0, %v46_v4, 0.0  ;;  %v38_v23 = vld [vmem:[#allocation2] sm:$0xff]  ;;  %v41_v25 = vld [vmem:[#allocation2 + $0x18] sm:$0xff]  ;;  %v43_v32 = vld [vmem:[#allocation2 + $0x28] sm:$0xff]  ;;  %vm207_vm2 = vcmask 1041409   ;;  %vm210_vm3 = vcmask 1042434  }
  0x1e   :  { %v48_v1 = vshrl.u32 %v47_v0, 7  ;;  %170 = vadd.xlane.f32.xlu0 %v169_v5  ;;  %v42_v28 = vld [vmem:[#allocation2 + $0x20] sm:$0xff]  ;;  %v44_v41 = vld [vmem:[#allocation2 + $0x30] sm:$0xff]  ;;  %v45_v51 = vld [vmem:[#allocation2 + $0x38] sm:$0xff]  ;;  %vm213_vm4 = vcmask 1043459   ;;  %vm216_vm5 = vcmask 1044484  }
  0x1f   :  { %v39_v57 = vld [vmem:[#allocation2 + $0x8] sm:$0xff]  ;;  %vm219_vm6 = vcmask 1045509   ;;  %vm222_vm7 = vcmask 1046534   ;;  %s322_s0 = smov [#allocation7]   ;;  %vm225_vm8 = vcmask 1047559  }
  0x20   :  { %v63_v2 = vsub.s32 2, %v48_v1  ;;  %v49_v3 = vsub.s32 0, %v48_v1  ;;  %v70_v8 = vsub.s32 3, %v48_v1  ;;  %v77_v10 = vsub.s32 4, %v48_v1  ;;  %s235_s1 = sshll.u32 %s322_s0, 4  ;;  %s236_s1 = int_to_ptr.vmem [resolvable:$true] %s235_s1 }
  0x21   :  { %v84_v12 = vsub.s32 5, %v48_v1  ;;  %v91_v14 = vsub.s32 6, %v48_v1  ;;  %v56_v15 = vsub.s32 1, %v48_v1  ;;  %v98_v17 = vsub.s32 7, %v48_v1  ;;  %s292_s21 = scalar_lea.vmem %s236_s1, 128  ;;  %p297_p11 = scmp.lt.s32.totalorder %s236_s1, %s236_s1 }
  0x22   :  { %v64_v6 = vrot.slane %v46_v4, %v63_v2  ;;  %v50_v7 = vrot.slane %v46_v4, %v49_v3  ;;  %v71_v9 = vrot.slane %v46_v4, %v70_v8  ;;  %v78_v11 = vrot.slane %v46_v4, %v77_v10  ;;  %p293_p10 = scmp.ne.s32.totalorder %s236_s1, %s292_s21  ;;  %p298_p12 = scmp.lt.s32.totalorder %s292_s21, %s292_s21 }
  0x23   :  { %v85_v13 = vrot.slane %v46_v4, %v84_v12  ;;  %v92_v16 = vrot.slane %v46_v4, %v91_v14  ;;  %v57_v18 = vrot.slane %v46_v4, %v56_v15  ;;  %v99_v19 = vrot.slane %v46_v4, %v98_v17 }
  0x24   :  { %66 = vbcast.lane.b32.xlu1 %v64_v6, 256  ;;  %p299_p13 = por %p298_p12, %p297_p11 }
  0x26   :  { %p300_p0 = pnand %p299_p13, %p293_p10 }
  0x28   :  { %52 = vbcast.lane.b32.xlu1 %v50_v7, 256 }
  0x2c   :  { %73 = vbcast.lane.b32.xlu1 %v71_v9, 256 }
  0x30   :  { %80 = vbcast.lane.b32.xlu1 %v78_v11, 256 }
  0x34   :  { %87 = vbcast.lane.b32.xlu1 %v85_v13, 256  ;;  %59 = vbcast.lane.b32.xlu0 %v57_v18, 256 }
  0x38   :  { %94 = vbcast.lane.b32.xlu1 %v92_v16, 256 }
  0x3c   :  { %101 = vbcast.lane.b32.xlu1 %v99_v19, 256 }
  0x96   :  { %v67_v20 = vpop.permute.xlu1 %66 }
  0x97   :  { %v105_v26 = vmul.f32 %v67_v20, %v40_v22 }
  0x99   :  { %v126_v33 = vsel %vm111_vm1, %v105_v26, 0.0 }
  0x9a   :  { %v53_v21 = vpop.permute.xlu1 %52  ;;  %v127_v38 = vrot.slane %v126_v33, 4 }
  0x9b   :  { %v103_v27 = vmul.f32 %v53_v21, %v38_v23 }
  0x9c   :  { %v128_v48 = vadd.f32 %v127_v38, %v126_v33 }
  0x9d   :  { %v112_v34 = vsel %vm111_vm1, %v103_v27, 0.0 }
  0x9e   :  { %v74_v24 = vpop.permute.xlu1 %73  ;;  %v113_v39 = vrot.slane %v112_v34, 4  ;;  %v129_v61 = vrot.slane %v128_v48, 2 }
  0x9f   :  { %v106_v30 = vmul.f32 %v74_v24, %v41_v25 }
  0xa0   :  { %v114_v49 = vadd.f32 %v113_v39, %v112_v34  ;;  %v130_v8 = vadd.f32 %v129_v61, %v128_v48 }
  0xa1   :  { %v133_v36 = vsel %vm111_vm1, %v106_v30, 0.0 }
  0xa2   :  { %v81_v29 = vpop.permute.xlu1 %80  ;;  %v134_v43 = vrot.slane %v133_v36, 4  ;;  %v115_v62 = vrot.slane %v114_v49, 2  ;;  %v131_v18 = vrot.slane %v130_v8, 1 }
  0xa3   :  { %v107_v31 = vmul.f32 %v81_v29, %v42_v28 }
  0xa4   :  { %v135_v54 = vadd.f32 %v134_v43, %v133_v36  ;;  %v116_v9 = vadd.f32 %v115_v62, %v114_v49  ;;  %v132_v28 = vadd.f32 %v131_v18, %v130_v8 }
  0xa5   :  { %v140_v40 = vsel %vm111_vm1, %v107_v31, 0.0 }
  0xa6   :  { %v88_v35 = vpop.permute.xlu1 %87  ;;  %v141_v45 = vrot.slane %v140_v40, 4  ;;  %v136_v3 = vrot.slane %v135_v54, 2  ;;  %v117_v19 = vrot.slane %v116_v9, 1 }
  0xa7   :  { %v108_v37 = vmul.f32 %v88_v35, %v43_v32  ;;  %v171_v50 = vpop.xlane.xlu0 %170 }
  0xa8   :  { %v172_v53 = vadd.f32 1e-08, %v171_v50  ;;  %v142_v58 = vadd.f32 %v141_v45, %v140_v40  ;;  %v137_v13 = vadd.f32 %v136_v3, %v135_v54  ;;  %v118_v29 = vadd.f32 %v117_v19, %v116_v9 }
  0xa9   :  { %v147_v42 = vsel %vm111_vm1, %v108_v37, 0.0 }
  0xaa   :  { %v95_v44 = vpop.permute.xlu1 %94  ;;  %v148_v46 = vrot.slane %v147_v42, 4  ;;  %250 = vrcp.f32 %v172_v53  ;;  %v143_v5 = vrot.slane %v142_v58, 2  ;;  %v138_v23 = vrot.slane %v137_v13, 1 }
  0xab   :  { %v109_v47 = vmul.f32 %v95_v44, %v44_v41  ;;  %v60_v63 = vpop.permute.xlu0 %59 }
  0xac   :  { %v149_v59 = vadd.f32 %v148_v46, %v147_v42  ;;  %v104_v2 = vmul.f32 %v60_v63, %v39_v57  ;;  %v144_v16 = vadd.f32 %v143_v5, %v142_v58  ;;  %v139_v36 = vadd.f32 %v138_v23, %v137_v13 }
  0xad   :  { %v154_v52 = vsel %vm111_vm1, %v109_v47, 0.0 }
  0xae   :  { %v155_v55 = vrot.slane %v154_v52, 4  ;;  %v102_v56 = vpop.permute.xlu1 %101  ;;  %v150_v6 = vrot.slane %v149_v59, 2  ;;  %v119_v7 = vsel %vm111_vm1, %v104_v2, 0.0  ;;  %v145_v25 = vrot.slane %v144_v16, 1 }
  0xaf   :  { %v110_v60 = vmul.f32 %v102_v56, %v45_v51  ;;  %v120_v11 = vrot.slane %v119_v7, 4 }
  0xb0   :  { %v156_v0 = vadd.f32 %v155_v55, %v154_v52  ;;  %v151_v17 = vadd.f32 %v150_v6, %v149_v59  ;;  %v146_v40 = vadd.f32 %v145_v25, %v144_v16 }
  0xb1   :  { %v161_v1 = vsel %vm111_vm1, %v110_v60, 0.0  ;;  %v121_v15 = vadd.f32 %v120_v11, %v119_v7 }
  0xb2   :  { %v162_v4 = vrot.slane %v161_v1, 4  ;;  %v157_v12 = vrot.slane %v156_v0, 2  ;;  %v152_v26 = vrot.slane %v151_v17, 1 }
  0xb3   :  { %v122_v21 = vrot.slane %v121_v15, 2 }
  0xb4   :  { %v163_v10 = vadd.f32 %v162_v4, %v161_v1  ;;  %v158_v22 = vadd.f32 %v157_v12, %v156_v0  ;;  %v153_v41 = vadd.f32 %v152_v26, %v151_v17 }
  0xb5   :  { %v123_v24 = vadd.f32 %v122_v21, %v121_v15 }
  0xb6   :  { %v164_v14 = vrot.slane %v163_v10, 2  ;;  %v159_v32 = vrot.slane %v158_v22, 1 }
  0xb7   :  { %v251_v27 = vpop.eup %250  ;;  %v124_v31 = vrot.slane %v123_v24, 1 }
  0xb8   :  { %v165_v20 = vadd.f32 %v164_v14, %v163_v10  ;;  %v175_v33 = vrot.slane %v251_v27, 1  ;;  %v176_v34 = vrot.slane %v251_v27, 2  ;;  %v177_v35 = vrot.slane %v251_v27, 3 }
  0xb9   :  { %v125_v37 = vadd.f32 %v124_v31, %v123_v24  ;;  %v178_v38 = vrot.slane %v251_v27, 4  ;;  %v179_v39 = vrot.slane %v251_v27, 5  ;;  %v180_v42 = vrot.slane %v251_v27, 6 }
  0xba   :  { %v166_v30 = vrot.slane %v165_v20, 1  ;;  %v192_v43 = vmul.f32 %v176_v34, %v132_v28  ;;  %v181_v46 = vrot.slane %v251_v27, 7  ;;  %v193_v47 = vmul.f32 %v177_v35, %v139_v36 }
  0xbb   :  { %v191_v45 = vmul.f32 %v175_v33, %v125_v37  ;;  %v160_v48 = vadd.f32 %v159_v32, %v158_v22  ;;  %v194_v49 = vmul.f32 %v178_v38, %v146_v40  ;;  %v190_v50 = vmul.f32 %v251_v27, %v118_v29 }
  0xbc   :  { %v167_v44 = vadd.f32 %v166_v30, %v165_v20  ;;  %v195_v52 = vmul.f32 %v179_v39, %v153_v41  ;;  %v209_v54 = vrot.slane %v192_v43, 6  ;;  %v212_v57 = vrot.slane %v193_v47, 5 }
  0xbd   :  { %v206_v51 = vrot.slane %v191_v45, 7  ;;  %v196_v53 = vmul.f32 %v180_v42, %v160_v48  ;;  %v215_v59 = vrot.slane %v194_v49, 4 }
  0xbe   :  { %v197_v56 = vmul.f32 %v181_v46, %v167_v44  ;;  %v218_v61 = vrot.slane %v195_v52, 3 }
  0xbf   :  { %v208_v55 = vsel %vm207_vm2, %v206_v51, %v190_v50  ;;  %v221_v63 = vrot.slane %v196_v53, 2 }
  0xc0   :  { %v211_v58 = vsel %vm210_vm3, %v209_v54, %v208_v55  ;;  %v224_v1 = vrot.slane %v197_v56, 1 }
  0xc1   :  { %v214_v60 = vsel %vm213_vm4, %v212_v57, %v211_v58 }
  0xc2   :  { %v217_v62 = vsel %vm216_vm5, %v215_v59, %v214_v60 }
  0xc3   :  { %v220_v0 = vsel %vm219_vm6, %v218_v61, %v217_v62 }
  0xc4   :  { %v223_v2 = vsel %vm222_vm7, %v221_v63, %v220_v0 }
  0xc5   :  { %v226_v3 = vsel %vm225_vm8, %v224_v1, %v223_v2 }
  0xc6   :  { %228 = vst.msk [vmem:[#allocation7] sm:$0xff] %vm111_vm1, %v226_v3 }
  0xc7   :  { %303 = shalt.err (!%p300_p0)
}
  0xc8   :  { %238 = dma.vmem_to_hbm [thread:$0]  %s236_s1, 128, %s358_s2, [#allocation4]  }
  0xc9   :  { %316 = dma.done.wait [#allocation4], 128  }
  0xca   :  { %317 = vsyncadd [#allocation4], 4294967168 }
  0xcb   :  { %242 = vsyncpa [#allocation3], 1 }
  0xcc   :  { %243 = vsyncpa [#allocation6], 1 }
  0xcd   :  { %244 = vsyncpa [#allocation4], 1 }

</bundles_post_ra>
